<compile_context>
chip_gen: v7x
topology: tpu7x:2x2x1
jax: 0.10.0
libtpu: 0.0.40
codegen_flags: <defaults>
</compile_context>

<pallas_src>
import functools

import jax
import jax.numpy as jnp
from jax.experimental import pallas as pl
from jax.experimental.pallas import tpu as pltpu


def _basic_block1d_kernel(*refs, has_downsample: bool):
    """Fused BasicBlock1D forward for one block of batch rows.

    Flattened "padded-row" layout: each batch row occupies Lp = L+2 consecutive
    lane columns ([0, x_row, 0]); a grid step processes block_n rows at once,
    T = block_n * Lp columns, with two extra zero columns on each block edge.

    refs (has_downsample=True):
      x_ref   : (1, Cin, T+4) bf16    flattened zero-padded rows (+2 edge zeros)
      mask_ref: (1, T+2) f32          1.0 on interior columns, 0.0 on padding
      w1_ref  : (Cout, 3*Cin) bf16    conv1 weights * BN1 scale (im2col layout)
      s1_ref  : (Cout, 1) f32         BN1 shift
      w2_ref  : (Cout, 3*Cout) bf16   conv2 weights * BN2 scale
      s2_ref  : (Cout, 1) f32         BN2 shift (+ downsample-BN shift)
      wd_ref  : (Cout, Cin) bf16      downsample 1x1 weights * BN_d scale
      o_ref   : (1, Cout, T)          output in the same flattened layout
    """
    if has_downsample:
        (x_ref, mask_ref, w1_ref, s1_ref, w2_ref, s2_ref, wd_ref, o_ref) = refs
    else:
        (x_ref, mask_ref, w1_ref, s1_ref, w2_ref, s2_ref, o_ref) = refs

    t = o_ref.shape[-1]          # block_n * (L + 2)
    wh = t + 2                   # intermediate carries one extra col each side

    xw = x_ref[0]                # (Cin, T+4) bf16

    # conv1 + folded BN1: one wide contraction (Cout, 3Cin) @ (3Cin, T+2)
    slab1 = jnp.concatenate(
        [xw[:, 0:wh], xw[:, 1:1 + wh], xw[:, 2:2 + wh]], axis=0)
    h = jnp.dot(w1_ref[...], slab1, preferred_element_type=jnp.float32)
    h = jnp.maximum(h + s1_ref[...], 0.0)
    # re-zero the per-row padding columns so conv2 sees correct zero padding
    h = (h * mask_ref[...]).astype(jnp.bfloat16)          # (Cout, T+2)

    # conv2 + folded BN2, same wide-contraction scheme (no scratch round-trip)
    slab2 = jnp.concatenate(
        [h[:, 0:t], h[:, 1:1 + t], h[:, 2:2 + t]], axis=0)
    y = jnp.dot(w2_ref[...], slab2, preferred_element_type=jnp.float32)

    # residual branch
    x_c = xw[:, 2:2 + t]                                  # (Cin, T)
    if has_downsample:
        idn = jnp.dot(wd_ref[...], x_c, preferred_element_type=jnp.float32)
    else:
        # NOTE: identity residual goes through the bf16 input (within tolerance)
        idn = x_c.astype(jnp.float32)

    # s2_ref already contains BN2 shift (+ BN_d shift when downsampling)
    o_ref[0] = jnp.maximum(y + idn + s2_ref[...], 0.0).astype(o_ref.dtype)


@functools.partial(jax.jit,
                   static_argnames=("stride", "eps", "block_n", "out_dtype"))
def basic_block_1d(x_ncl, conv1_w, bn1, conv2_w, bn2, downsample=None, *,
                   stride=1, eps=1e-5, block_n=None, out_dtype=jnp.float32):
    """BasicBlock1D forward (eval-mode BN).

    x_ncl   : (N, Cin, L) f32, PyTorch NCL layout.
    conv*_w : torch Conv1d weights (Cout, Cin_of_that_conv, 3), no bias.
    bn*     : (gamma, beta, running_mean, running_var) each (Cout,).
    downsample: None, or (w_1x1 (Cout, Cin, 1), (gamma, beta, mean, var)).
    Returns (N, Cout, L) in out_dtype (default f32).
    """
    assert stride == 1  # TODO(synk): stride > 1 not implemented
    N, Cin, L = x_ncl.shape
    Cout, _, K = conv1_w.shape
    assert K == 3 and conv2_w.shape == (Cout, Cout, 3)
    has_downsample = downsample is not None
    if not has_downsample:
        assert Cin == Cout, "identity residual requires in_channels == out_channels"

    # ---- fold BN scale (in f32) into weights; keep only the additive shift ----
    def fold(w_oik, bn_p):
        g, b, m, v = bn_p
        scale = g / jnp.sqrt(v + eps)                             # (Cout,)
        shift = (b - m * scale).astype(jnp.float32)[:, None]      # (Cout, 1)
        o, i, kk = w_oik.shape
        w2d = jnp.transpose(w_oik, (0, 2, 1)).reshape(o, kk * i)  # [o, k*Cin + c]
        w2d = (w2d * scale[:, None]).astype(jnp.bfloat16)         # fold f32, cast once
        return w2d, shift

    w1_2d, shift1 = fold(conv1_w, bn1)    # (Cout, 3*Cin),  (Cout, 1)
    w2_2d, shift2 = fold(conv2_w, bn2)    # (Cout, 3*Cout), (Cout, 1)
    if has_downsample:
        wd_oik, bnd = downsample
        wd_2d, shift_d = fold(wd_oik, bnd)        # (Cout, Cin), (Cout, 1)
        shift2 = shift2 + shift_d                 # single additive epilogue term

    Lp = L + 2
    out_itemsize = jnp.dtype(out_dtype).itemsize

    # ---- block_n: large lane dim per MXU pass, VMEM-bounded, >=2 grid steps ----
    if block_n is None:
        target_cols = 1024
        bytes_per_row = Cin * Lp * 2 + Cout * Lp * out_itemsize
        max_rows_vmem = max(1, (40 << 20) // (8 * bytes_per_row))
        divisors = [d for d in range(1, N + 1) if N % d == 0]
        cands = [d for d in divisors
                 if d * Lp <= max(target_cols, Lp) and d <= max_rows_vmem]
        two_step = [d for d in cands if N // d >= 2]
        block_n = max(two_step) if two_step else (max(cands) if cands else 1)
    assert N % block_n == 0
    NB = N // block_n
    T = block_n * Lp

    # ---- NCL -> flattened padded-row layout: (NB, Cin, T+4), bf16 ----
    # Each row becomes [0, x_row, 0]; the two extra zero columns on each block
    # edge feed the out-of-range taps of the (discarded) per-row border columns.
    x_pad = jnp.pad(x_ncl, ((0, 0), (0, 0), (1, 1)))              # (N, Cin, Lp)
    x_b = x_pad.reshape(NB, block_n, Cin, Lp).transpose(0, 2, 1, 3)
    x_b = x_b.reshape(NB, Cin, T)
    x_b = jnp.pad(x_b, ((0, 0), (0, 0), (2, 2))).astype(jnp.bfloat16)

    # interior-column mask for the conv1->conv2 intermediate (width T+2;
    # column i corresponds to flattened position i-1)
    pos = jnp.arange(T + 2) - 1
    interior = ((pos >= 0) & (pos < T)
                & (pos % Lp != 0) & (pos % Lp != Lp - 1))
    mask = interior.astype(jnp.float32)[None, :]                  # (1, T+2)

    in_arrays = [x_b, mask, w1_2d, shift1, w2_2d, shift2]
    in_specs = [
        pl.BlockSpec((1, Cin, T + 4), lambda n: (n, 0, 0)),
        pl.BlockSpec((1, T + 2), lambda n: (0, 0)),
        pl.BlockSpec((Cout, 3 * Cin), lambda n: (0, 0)),
        pl.BlockSpec((Cout, 1), lambda n: (0, 0)),
        pl.BlockSpec((Cout, 3 * Cout), lambda n: (0, 0)),
        pl.BlockSpec((Cout, 1), lambda n: (0, 0)),
    ]
    if has_downsample:
        in_arrays.append(wd_2d)
        in_specs.append(pl.BlockSpec((Cout, Cin), lambda n: (0, 0)))

    # ---- derived VMEM limit (double-buffered blocks + weights + live slabs) ----
    x_blk = Cin * (T + 4) * 2
    o_blk = Cout * T * out_itemsize
    w_bytes = sum(int(a.size) * a.dtype.itemsize for a in in_arrays[1:])
    interm = (3 * Cin + 3 * Cout) * (T + 2) * 2 + 3 * Cout * (T + 2) * 4
    need = 2 * (x_blk + o_blk) + 2 * w_bytes + interm + (2 << 20)
    try:
        phys_vmem = int(pltpu.get_tpu_info().vmem_capacity_bytes)
    except Exception:
        phys_vmem = 64 << 20          # conservative (v7x has 64 MiB per TC)
    vmem_limit = int(min(max(need, 16 << 20), int(phys_vmem * 0.75)))

    flops = 2 * N * L * Cout * (3 * Cin + 3 * Cout
                                + (Cin if has_downsample else 0))
    bytes_accessed = (int(x_b.size) * 2 + NB * Cout * T * out_itemsize
                      + int(w_bytes))

    out = pl.pallas_call(
        functools.partial(_basic_block1d_kernel, has_downsample=has_downsample),
        out_shape=jax.ShapeDtypeStruct((NB, Cout, T), out_dtype),
        grid_spec=pltpu.PrefetchScalarGridSpec(
            num_scalar_prefetch=0,
            grid=(NB,),
            in_specs=in_specs,
            out_specs=pl.BlockSpec((1, Cout, T), lambda n: (n, 0, 0)),
        ),
        compiler_params=pltpu.CompilerParams(
            dimension_semantics=("parallel",),
            vmem_limit_bytes=vmem_limit),
        cost_estimate=pl.CostEstimate(flops=flops, transcendentals=0,
                                      bytes_accessed=bytes_accessed),
    )(*in_arrays)

    # flattened padded-row layout -> (N, Cout, L)
    out = out.reshape(NB, Cout, block_n, Lp).transpose(0, 2, 1, 3)
    out = out.reshape(N, Cout, Lp)[:, :, 1:1 + L]
    return out


def _reference(x, w1, bn1, w2, bn2, downsample, eps=1e-5):
    """Pure-JAX f32 mirror of the PyTorch BasicBlock1D forward (eval mode)."""
    dn = ("NCH", "OIH", "NCH")

    def bn(y, p):
        g, b, m, v = p
        return ((y - m[None, :, None]) / jnp.sqrt(v[None, :, None] + eps)
                * g[None, :, None] + b[None, :, None])

    h = jax.lax.conv_general_dilated(x, w1, (1,), ((1, 1),),
                                     dimension_numbers=dn)
    h = jnp.maximum(bn(h, bn1), 0.0)
    y = jax.lax.conv_general_dilated(h, w2, (1,), ((1, 1),),
                                     dimension_numbers=dn)
    y = bn(y, bn2)
    if downsample is not None:
        wd, bnd = downsample
        idn = jax.lax.conv_general_dilated(x, wd, (1,), ((0, 0),),
                                           dimension_numbers=dn)
        idn = bn(idn, bnd)
    else:
        idn = x
    return jnp.maximum(y + idn, 0.0)


if __name__ == "__main__":
    key = jax.random.PRNGKey(0)
    ks = jax.random.split(key, 12)

    def bn_params(k, C):
        k1, k2, k3, k4 = jax.random.split(k, 4)
        gamma = 1.0 + 0.1 * jax.random.normal(k1, (C,), jnp.float32)
        beta = 0.1 * jax.random.normal(k2, (C,), jnp.float32)
        mean = 0.1 * jax.random.normal(k3, (C,), jnp.float32)
        var = jnp.abs(jax.random.normal(k4, (C,), jnp.float32)) + 1.0
        return gamma, beta, mean, var

    # ---- Test A: channel change -> downsample (1x1 conv + BN); N=4 exercises
    #      multi-row blocks (block_n=2) and a 2-step parallel grid. ----
    N, Cin, Cout, L = 4, 16, 32, 24
    x = jax.random.normal(ks[0], (N, Cin, L), jnp.float32)
    w1 = 0.1 * jax.random.normal(ks[1], (Cout, Cin, 3), jnp.float32)
    w2 = 0.1 * jax.random.normal(ks[2], (Cout, Cout, 3), jnp.float32)
    wd = 0.1 * jax.random.normal(ks[3], (Cout, Cin, 1), jnp.float32)
    bn1 = bn_params(ks[4], Cout)
    bn2 = bn_params(ks[5], Cout)
    bnd = bn_params(ks[6], Cout)

    out_a = jax.block_until_ready(
        basic_block_1d(x, w1, bn1, w2, bn2, downsample=(wd, bnd)))
    ref_a = _reference(x, w1, bn1, w2, bn2, (wd, bnd))
    assert out_a.shape == (N, Cout, L)
    # tolerance accounts for bf16 input/weight quantization in the kernel
    assert jnp.allclose(out_a, ref_a, atol=3e-2, rtol=3e-2), (
        f"mismatch A: max abs err {jnp.max(jnp.abs(out_a - ref_a))}")

    # ---- Test B: same channels, no downsample (identity matmul compiled out) ----
    NB_, C = 2, 32
    xb = jax.random.normal(ks[7], (NB_, C, L), jnp.float32)
    w1b = 0.1 * jax.random.normal(ks[8], (C, C, 3), jnp.float32)
    w2b = 0.1 * jax.random.normal(ks[9], (C, C, 3), jnp.float32)
    bn1b = bn_params(ks[10], C)
    bn2b = bn_params(ks[11], C)

    out_b = jax.block_until_ready(
        basic_block_1d(xb, w1b, bn1b, w2b, bn2b, downsample=None))
    ref_b = _reference(xb, w1b, bn1b, w2b, bn2b, None)
    assert out_b.shape == (NB_, C, L)
    assert jnp.allclose(out_b, ref_b, atol=3e-2, rtol=3e-2), (
        f"mismatch B: max abs err {jnp.max(jnp.abs(out_b - ref_b))}")

    print("KERNEL_OK")
</pallas_src>

<mosaic_0001>
module attributes {stable_mosaic.version = 11 : i64} {
  func.func @_basic_block1d_kernel(%arg0: i32, %arg1: memref<1x16x56xbf16, #tpu.memory_space<vmem>>, %arg2: memref<1x54xf32, #tpu.memory_space<vmem>>, %arg3: memref<32x48xbf16, #tpu.memory_space<vmem>>, %arg4: memref<32x1xf32, #tpu.memory_space<vmem>>, %arg5: memref<32x96xbf16, #tpu.memory_space<vmem>>, %arg6: memref<32x1xf32, #tpu.memory_space<vmem>>, %arg7: memref<32x16xbf16, #tpu.memory_space<vmem>>, %arg8: memref<1x32x52xf32, #tpu.memory_space<vmem>>) attributes {dimension_semantics = [#tpu.dimension_semantics<parallel>], iteration_bounds = array<i64: 2>, scalar_prefetch = 0 : i64, scratch_operands = 0 : i64, tpu.core_type = #tpu.core_type<tc>, window_params = [{transform_indices = @transform_0, window_bounds = array<i64: 1, 16, 56>}, {pipeline_mode = #tpu.pipeline_mode<synchronous>, transform_indices = @transform_1, window_bounds = array<i64: 1, 54>}, {pipeline_mode = #tpu.pipeline_mode<synchronous>, transform_indices = @transform_2, window_bounds = array<i64: 32, 48>}, {pipeline_mode = #tpu.pipeline_mode<synchronous>, transform_indices = @transform_3, window_bounds = array<i64: 32, 1>}, {pipeline_mode = #tpu.pipeline_mode<synchronous>, transform_indices = @transform_4, window_bounds = array<i64: 32, 96>}, {pipeline_mode = #tpu.pipeline_mode<synchronous>, transform_indices = @transform_5, window_bounds = array<i64: 32, 1>}, {pipeline_mode = #tpu.pipeline_mode<synchronous>, transform_indices = @transform_6, window_bounds = array<i64: 32, 16>}, {transform_indices = @transform_7, window_bounds = array<i64: 1, 32, 52>}]} {
    %c0 = arith.constant 0 : index
    %c0_0 = arith.constant 0 : index
    %c0_1 = arith.constant 0 : index
    %0 = vector.load %arg1[%c0, %c0_0, %c0_1] : memref<1x16x56xbf16, #tpu.memory_space<vmem>>, vector<1x16x56xbf16>
    %1 = vector.shape_cast %0 : vector<1x16x56xbf16> to vector<16x56xbf16>
    %2 = vector.extract_strided_slice %1 {offsets = [0, 0], sizes = [16, 54], strides = [1, 1]} : vector<16x56xbf16> to vector<16x54xbf16>
    %3 = vector.extract_strided_slice %1 {offsets = [0, 1], sizes = [16, 54], strides = [1, 1]} : vector<16x56xbf16> to vector<16x54xbf16>
    %4 = vector.extract_strided_slice %1 {offsets = [0, 2], sizes = [16, 54], strides = [1, 1]} : vector<16x56xbf16> to vector<16x54xbf16>
    %5 = tpu.concatenate %2, %3, %4 in 0 : vector<16x54xbf16>, vector<16x54xbf16>, vector<16x54xbf16> -> vector<48x54xbf16>
    %c0_2 = arith.constant 0 : index
    %c0_3 = arith.constant 0 : index
    %6 = vector.load %arg3[%c0_2, %c0_3] : memref<32x48xbf16, #tpu.memory_space<vmem>>, vector<32x48xbf16>
    %cst = arith.constant dense<0.000000e+00> : vector<32x54xf32>
    %7 = tpu.matmul %6, %5, %cst {dimension_numbers = #tpu.dot_dimension_numbers<[1], [0], [0], [1], [0, 0, 1, 1], [], []>} : vector<32x48xbf16>, vector<48x54xbf16>, vector<32x54xf32> -> vector<32x54xf32>
    %c0_4 = arith.constant 0 : index
    %c0_5 = arith.constant 0 : index
    %8 = vector.load %arg4[%c0_4, %c0_5] : memref<32x1xf32, #tpu.memory_space<vmem>>, vector<32x1xf32>
    %9 = vector.broadcast %8 : vector<32x1xf32> to vector<32x54xf32>
    %10 = arith.addf %7, %9 : vector<32x54xf32>
    %cst_6 = arith.constant 0.000000e+00 : f32
    %11 = vector.broadcast %cst_6 : f32 to vector<32x54xf32>
    %12 = arith.maximumf %10, %11 : vector<32x54xf32>
    %c0_7 = arith.constant 0 : index
    %c0_8 = arith.constant 0 : index
    %13 = vector.load %arg2[%c0_7, %c0_8] : memref<1x54xf32, #tpu.memory_space<vmem>>, vector<1x54xf32>
    %14 = vector.broadcast %13 : vector<1x54xf32> to vector<32x54xf32>
    %15 = arith.mulf %12, %14 : vector<32x54xf32>
    %16 = arith.truncf %15 : vector<32x54xf32> to vector<32x54xbf16>
    %17 = vector.extract_strided_slice %16 {offsets = [0, 0], sizes = [32, 52], strides = [1, 1]} : vector<32x54xbf16> to vector<32x52xbf16>
    %18 = vector.extract_strided_slice %16 {offsets = [0, 1], sizes = [32, 52], strides = [1, 1]} : vector<32x54xbf16> to vector<32x52xbf16>
    %19 = vector.extract_strided_slice %16 {offsets = [0, 2], sizes = [32, 52], strides = [1, 1]} : vector<32x54xbf16> to vector<32x52xbf16>
    %20 = tpu.concatenate %17, %18, %19 in 0 : vector<32x52xbf16>, vector<32x52xbf16>, vector<32x52xbf16> -> vector<96x52xbf16>
    %c0_9 = arith.constant 0 : index
    %c0_10 = arith.constant 0 : index
    %21 = vector.load %arg5[%c0_9, %c0_10] : memref<32x96xbf16, #tpu.memory_space<vmem>>, vector<32x96xbf16>
    %cst_11 = arith.constant dense<0.000000e+00> : vector<32x52xf32>
    %22 = tpu.matmul %21, %20, %cst_11 {dimension_numbers = #tpu.dot_dimension_numbers<[1], [0], [0], [1], [0, 0, 1, 1], [], []>} : vector<32x96xbf16>, vector<96x52xbf16>, vector<32x52xf32> -> vector<32x52xf32>
    %23 = vector.extract_strided_slice %1 {offsets = [0, 2], sizes = [16, 52], strides = [1, 1]} : vector<16x56xbf16> to vector<16x52xbf16>
    %c0_12 = arith.constant 0 : index
    %c0_13 = arith.constant 0 : index
    %24 = vector.load %arg7[%c0_12, %c0_13] : memref<32x16xbf16, #tpu.memory_space<vmem>>, vector<32x16xbf16>
    %cst_14 = arith.constant dense<0.000000e+00> : vector<32x52xf32>
    %25 = tpu.matmul %24, %23, %cst_14 {dimension_numbers = #tpu.dot_dimension_numbers<[1], [0], [0], [1], [0, 0, 1, 1], [], []>} : vector<32x16xbf16>, vector<16x52xbf16>, vector<32x52xf32> -> vector<32x52xf32>
    %26 = arith.addf %22, %25 : vector<32x52xf32>
    %c0_15 = arith.constant 0 : index
    %c0_16 = arith.constant 0 : index
    %27 = vector.load %arg6[%c0_15, %c0_16] : memref<32x1xf32, #tpu.memory_space<vmem>>, vector<32x1xf32>
    %28 = vector.broadcast %27 : vector<32x1xf32> to vector<32x52xf32>
    %29 = arith.addf %26, %28 : vector<32x52xf32>
    %cst_17 = arith.constant 0.000000e+00 : f32
    %30 = vector.broadcast %cst_17 : f32 to vector<32x52xf32>
    %31 = arith.maximumf %29, %30 : vector<32x52xf32>
    %c0_18 = arith.constant 0 : index
    %c0_19 = arith.constant 0 : index
    %c0_20 = arith.constant 0 : index
    %32 = vector.load %arg8[%c0_18, %c0_19, %c0_20] : memref<1x32x52xf32, #tpu.memory_space<vmem>>, vector<1x32x52xf32>
    %33 = vector.shape_cast %32 : vector<1x32x52xf32> to vector<32x52xf32>
    %34 = vector.shape_cast %31 : vector<32x52xf32> to vector<1x32x52xf32>
    tpu.vector_store %arg8[%c0_18, %c0_19, %c0_20], %34 {strides = array<i32>} : memref<1x32x52xf32, #tpu.memory_space<vmem>>, vector<1x32x52xf32>,
    return
  }
  func.func @transform_0(%arg0: i32) -> (i32, i32, i32) {
    %c0_i32 = arith.constant 0 : i32
    %c0_i32_0 = arith.constant 0 : i32
    %c0_i32_1 = arith.constant 0 : i32
    return %arg0, %c0_i32, %c0_i32_0 : i32, i32, i32
  }
  func.func @transform_1(%arg0: i32) -> (i32, i32) {
    %c0_i32 = arith.constant 0 : i32
    %c0_i32_0 = arith.constant 0 : i32
    %c0_i32_1 = arith.constant 0 : i32
    return %c0_i32, %c0_i32_0 : i32, i32
  }
  func.func @transform_2(%arg0: i32) -> (i32, i32) {
    %c0_i32 = arith.constant 0 : i32
    %c0_i32_0 = arith.constant 0 : i32
    %c0_i32_1 = arith.constant 0 : i32
    return %c0_i32, %c0_i32_0 : i32, i32
  }
  func.func @transform_3(%arg0: i32) -> (i32, i32) {
    %c0_i32 = arith.constant 0 : i32
    %c0_i32_0 = arith.constant 0 : i32
    %c0_i32_1 = arith.constant 0 : i32
    return %c0_i32, %c0_i32_0 : i32, i32
  }
  func.func @transform_4(%arg0: i32) -> (i32, i32) {
    %c0_i32 = arith.constant 0 : i32
    %c0_i32_0 = arith.constant 0 : i32
    %c0_i32_1 = arith.constant 0 : i32
    return %c0_i32, %c0_i32_0 : i32, i32
  }
  func.func @transform_5(%arg0: i32) -> (i32, i32) {
    %c0_i32 = arith.constant 0 : i32
    %c0_i32_0 = arith.constant 0 : i32
    %c0_i32_1 = arith.constant 0 : i32
    return %c0_i32, %c0_i32_0 : i32, i32
  }
  func.func @transform_6(%arg0: i32) -> (i32, i32) {
    %c0_i32 = arith.constant 0 : i32
    %c0_i32_0 = arith.constant 0 : i32
    %c0_i32_1 = arith.constant 0 : i32
    return %c0_i32, %c0_i32_0 : i32, i32
  }
  func.func @transform_7(%arg0: i32) -> (i32, i32, i32) {
    %c0_i32 = arith.constant 0 : i32
    %c0_i32_0 = arith.constant 0 : i32
    %c0_i32_1 = arith.constant 0 : i32
    return %arg0, %c0_i32, %c0_i32_0 : i32, i32, i32
  }
}

</mosaic_0001>

<bundles_post_ra>
// kernel: basic_block_1d.1
= control target key start
LH: loop header
LB: loop body
LE: loop exit
PB: predicated region body
PF: predicated region fallthrough
CT: control target
= control target key end

     0   :  { %s801_s24 = smov 0   ;;  %s877_s0 = inlined_call_operand.vmem [shape: bf16[2,16,56], index: 0, kind: input, shape index: {}]   ;;  %s878_s1 = inlined_call_operand.vmem [shape: f32[1,54], index: 1, kind: input, shape index: {}]   ;;  %s879_s2 = inlined_call_operand.vmem [shape: bf16[32,48], index: 2, kind: input, shape index: {}]   ;;  %s880_s3 = inlined_call_operand.vmem [shape: f32[32,1], index: 3, kind: input, shape index: {}]   ;;  %s881_s4 = inlined_call_operand.vmem [shape: bf16[32,96], index: 4, kind: input, shape index: {}]   ;;  %s882_s5 = inlined_call_operand.vmem [shape: f32[32,1], index: 5, kind: input, shape index: {}]   ;;  %s883_s6 = inlined_call_operand.vmem [shape: bf16[32,16], index: 6, kind: input, shape index: {}]   ;;  %s884_s7 = inlined_call_operand.vmem [shape: f32[2,32,52], index: 7, kind: output, shape index: {}]  }
   0x1 LB: > { %s651_s25 = sadd.s32 4294967295, %s756_s24   ;;  %p655_p0 = scmp.ge.s32.totalorder %s756_s24, 1  ;;  %s756_s24 = sphi %s801_s24, %s17_s24  }
   0x2   : > { %p237_p1 = scmp.lt.s32.totalorder %s756_s24, 3 }
   0x4   : > { %p238_p2 = pnand %p655_p0, %p237_p1 }
   0x5   : > { %p269_p3 = scmp.lt.s32.totalorder (!%p238_p2), %s651_s25, 1  ;;  %v744_v0 = vld [vmem:[%s879_s2] sm:$0xff] (!%p238_p2)   ;;  %vm332_vm0 = vcmask (!%p238_p2), 392192   ;;  %v758_v2 = vmov (!%p238_p2), 0   ;;  %v299_v4 = vld [vmem:[%s880_s3 + $0x8] sm:$0xff] (!%p238_p2)  ;;  %s759_s13 = smov (!%p238_p2), 127  }
   0x6   : > { %241 = sbr.rel (%p238_p2) target bundleno = 716 (0x2cc), region = 48  ;;  %700 = vmatprep.mubr.msk.bf16.mxu0 (!%p238_p2), %vm332_vm0, %v744_v0  ;;  %v298_v1 = vld [vmem:[%s880_s3] sm:$0xff] (!%p238_p2)  ;;  %741 = vset.pattern.permute.xlu1 (!%p238_p2), %v758_v2  ;;  %v301_v5 = vld [vmem:[%s880_s3 + $0x18] sm:$0xff] (!%p238_p2)  ;;  %s760_s16 = smov (!%p238_p2), 126   ;;  %v300_v6 = vld [vmem:[%s880_s3 + $0x10] sm:$0xff] (!%p238_p2)  ;;  %vm437_vm1 = vcmask (!%p238_p2), 130048  }
   0x7   : > { %742 = vset.pattern.permute.xlu0 (!%p238_p2), %v758_v2  ;;  %304 = vperm.xlu1 (!%p238_p2), %741, %v298_v1   ;;  %v745_v9 = vld [vmem:[%s879_s2 + $0x8] sm:$0xff] (!%p238_p2)   ;;  %v665_v22 = vld [vmem:[%s878_s1] ss:$0 sm:$0xff] (!%p238_p2)  ;;  %vm503_vm2 = vcmask (!%p238_p2), 785408   ;;  %v562_v38 = vld [vmem:[%s882_s5 + $0x18] sm:$0xff] (!%p238_p2)  ;;  %vm591_vm3 = vcmask (!%p238_p2), 424960  }
   0x8   : > { %v746_v32 = vld [vmem:[%s883_s6] sm:$0xff] (!%p238_p2)   ;;  %v747_v33 = vld [vmem:[%s883_s6 + $0x8] sm:$0xff] (!%p238_p2)   ;;  %v561_v39 = vld [vmem:[%s882_s5 + $0x10] sm:$0xff] (!%p238_p2) }
   0x9   : > { %v748_v35 = vld [vmem:[%s881_s4] sm:$0xff] (!%p238_p2)   ;;  %v560_v36 = vld [vmem:[%s882_s5 + $0x8] sm:$0xff] (!%p238_p2) }
   0xa   : > { %722 = vmatprep.mubr.msk.bf16.mxu1 (!%p238_p2), %vm503_vm2, %v748_v35  ;;  %v559_v37 = vld [vmem:[%s882_s5] sm:$0xff] (!%p238_p2)  ;;  %v749_v44 = vld [vmem:[%s881_s4 + $0x8] sm:$0xff] (!%p238_p2)  }
   0xb   : > { %309 = vperm.xlu1 (!%p238_p2), %741, %v299_v4  }
   0xd   : > { %s886_s25 = smov (!%p269_p3, %s651_s25), 1 }
   0xe   : > { %s676_s28 = sshll.u32 %s886_s25, 3  ;;  %s677_s18 = sshll.u32 %s886_s25, 5 }
   0xf   : > { %s273_s10 = scalar_lea.vmem %s877_s0, %s676_s28  ;;  %319 = vperm.xlu1 %741, %v301_v5   ;;  %s278_s21 = scalar_lea.vmem %s884_s7, %s677_s18 }
  0x10   : > { %v743_v3 = vld [vmem:[%s273_s10] sm:$0xff]  }
  0x11   : > { %288 = vrot.lane.b32.xlu0 %v743_v3, %s759_s13  ;;  %694 = vmatprep.subr.bf16.mxu0 %v743_v3 }
  0x12   : > { %695 = vmatpush3.bf16.msra.mxu0 %v743_v3 }
  0x15   : > { %291 = vrot.lane.b32.xlu0 %v743_v3, %s760_s16 }
  0x19   : > { %314 = vperm.xlu0 %742, %v300_v6  }
  0x83   : > { %v289_v7 = vpop.permute.xlu0 %288 }
  0x84   : > { %696 = vmatprep.subr.bf16.mxu0 %v289_v7 }
  0x85   : > { %697 = vmatpush3.bf16.msra.mxu0 %v289_v7 }
  0x86   : > { %v305_v10 = vpop.permute.xlu1 %304 }
  0x87   : > { %v292_v8 = vpop.permute.xlu0 %291 }
  0x88   : > { %698 = vmatprep.subr.bf16.mxu0 %v292_v8 }
  0x89   : > { %699 = vmatpush3.bf16.msra.mxu0 %v292_v8 }
  0x8a   : > { %704 = vmatprep.subr.bf16.mxu0 %v292_v8  ;;  %v310_v11 = vpop.permute.xlu1 %309 }
  0x8c   : > { %701 = vmatmul.mubr.msk.bf16.vlgmr.msra.gmra.mrb[0].mxu0 %vm332_vm0, %v745_v9 }
  0x8d   : > { %705 = vmatpush3.bf16.msra.mxu0 %v292_v8  ;;  %706 = vmatprep.mubr.msk.bf16.mxu0 %vm437_vm1, %v746_v32 }
  0x8e   : > { %v320_v16 = vpop.permute.xlu1 %319 }
  0x94   : > { %707 = vmatmul.mubr.msk.bf16.vlgmr.msra.gmra.mrb[4].mxu0 %vm437_vm1, %v747_v33 }
  0x98   : > { %v315_v12 = vpop.permute.xlu0 %314 }
 0x15f   : > { %v702_v13 = vpop.f32.mrb[0].mxu0 }
 0x160   : > { %v382_v14 = vadd.f32 %v702_v13, %v315_v12  ;;  %v373_v15 = vpop.f32.mrb[1].mxu0 }
 0x161   : > { %v374_v17 = vadd.f32 %v373_v15, %v305_v10  ;;  %v703_v18 = vpop.f32.mrb[2].mxu0 }
 0x162   : > { %v390_v19 = vmax.f32 %v382_v14, 0.0  ;;  %v385_v20 = vadd.f32 %v703_v18, %v320_v16  ;;  %v376_v21 = vpop.f32.mrb[3].mxu0 }
 0x163   : > { %v388_v23 = vmax.f32 %v374_v17, 0.0  ;;  %v377_v24 = vadd.f32 %v376_v21, %v310_v11 }
 0x164   : > { %v391_v25 = vmax.f32 %v385_v20, 0.0  ;;  %v401_v27 = vmul.f32 %v665_v22, %v390_v19 }
 0x165   : > { %v389_v26 = vmax.f32 %v377_v24, 0.0  ;;  %v399_v29 = vmul.f32 %v665_v22, %v388_v23 }
 0x166   : > { %v402_v28 = vmul.f32 %v665_v22, %v391_v25 }
 0x167   : > { %v400_v30 = vmul.f32 %v665_v22, %v389_v26  ;;  %v708_v45 = vpop.f32.mrb[4].mxu0 }
 0x168   : > { %v404_v31 = vpack.c.bf16 %v402_v28, %v401_v27  ;;  %v478_v46 = vpop.f32.mrb[5].mxu0 }
 0x169   : > { %v403_v34 = vpack.c.bf16 %v400_v30, %v399_v29  ;;  %v709_v47 = vpop.f32.mrb[6].mxu0 }
 0x16a   : > { %409 = vrot.lane.b32.xlu0 %v404_v31, %s759_s13  ;;  %v481_v48 = vpop.f32.mrb[7].mxu0 }
 0x16b   : > { %407 = vrot.lane.b32.xlu1 %v403_v34, %s759_s13  ;;  %710 = vmatprep.subr.bf16.mxu1 %v403_v34 }
 0x16c   : > { %711 = vmatpush3.bf16.msra.mxu1 %v403_v34 }
 0x16d   : > { %712 = vmatprep.subr.bf16.mxu1 %v404_v31 }
 0x16e   : > { %415 = vrot.lane.b32.xlu0 %v404_v31, %s760_s16 }
 0x16f   : > { %413 = vrot.lane.b32.xlu1 %v403_v34, %s760_s16 }
 0x170   : > { %713 = vmatpush3.bf16.msra.mxu1 %v404_v31 }
 0x172   : > { %570 = vperm.xlu0 %742, %v560_v36  }
 0x173   : > { %565 = vperm.xlu1 %741, %v559_v37  }
 0x176   : > { %580 = vperm.xlu0 %742, %v562_v38  }
 0x177   : > { %575 = vperm.xlu1 %741, %v561_v39  }
 0x1dc   : > { %v410_v41 = vpop.permute.xlu0 %409 }
 0x1dd   : > { %v408_v40 = vpop.permute.xlu1 %407 }
 0x1de   : > { %714 = vmatprep.subr.bf16.mxu1 %v408_v40 }
 0x1df   : > { %715 = vmatpush3.bf16.msra.mxu1 %v408_v40 }
 0x1e0   : > { %716 = vmatprep.subr.bf16.mxu1 %v410_v41  ;;  %v416_v43 = vpop.permute.xlu0 %415 }
 0x1e1   : > { %v414_v42 = vpop.permute.xlu1 %413 }
 0x1e3   : > { %717 = vmatpush3.bf16.msra.mxu1 %v410_v41 }
 0x1e4   : > { %718 = vmatprep.subr.bf16.mxu1 %v414_v42 }
 0x1e7   : > { %719 = vmatpush3.bf16.msra.mxu1 %v414_v42 }
 0x1e8   : > { %720 = vmatprep.subr.bf16.mxu1 %v416_v43 }
 0x1eb   : > { %721 = vmatpush3.bf16.msra.mxu1 %v416_v43 }
 0x1ee   : > { %723 = vmatmul.mubr.msk.bf16.vlgmr.msra.gmra.mrb[0].mxu1 %vm503_vm2, %v749_v44 }
 0x1f1   : > { %v571_v50 = vpop.permute.xlu0 %570 }
 0x1f2   : > { %v566_v49 = vpop.permute.xlu1 %565 }
 0x1f5   : > { %v581_v60 = vpop.permute.xlu0 %580 }
 0x1f6   : > { %v576_v54 = vpop.permute.xlu1 %575 }
 0x2c1   : > { %v724_v51 = vpop.f32.mrb[0].mxu1 }
 0x2c2   : > { %v553_v52 = vadd.f32 %v724_v51, %v708_v45  ;;  %v544_v53 = vpop.f32.mrb[1].mxu1 }
 0x2c3   : > { %v545_v55 = vadd.f32 %v544_v53, %v478_v46  ;;  %v725_v56 = vpop.f32.mrb[2].mxu1 }
 0x2c4   : > { %v585_v57 = vadd.f32 %v576_v54, %v553_v52  ;;  %v556_v58 = vadd.f32 %v725_v56, %v709_v47  ;;  %v547_v59 = vpop.f32.mrb[3].mxu1 }
 0x2c5   : > { %v583_v61 = vadd.f32 %v566_v49, %v545_v55  ;;  %v548_v62 = vadd.f32 %v547_v59, %v481_v48 }
 0x2c6   : > { %v589_v63 = vmax.f32 %v585_v57, 0.0  ;;  %v586_v0 = vadd.f32 %v581_v60, %v556_v58 }
 0x2c7   : > { %v587_v1 = vmax.f32 %v583_v61, 0.0  ;;  %v584_v2 = vadd.f32 %v571_v50, %v548_v62 }
 0x2c8   : > { %594 = vst.msk [vmem:[%s278_s21 + $0x10] sm:$0xff] %vm591_vm3, %v589_v63  ;;  %v590_v3 = vmax.f32 %v586_v0, 0.0 }
 0x2c9   : > { %592 = vst.msk [vmem:[%s278_s21] sm:$0xff] %vm591_vm3, %v587_v1  ;;  %v588_v4 = vmax.f32 %v584_v2, 0.0 }
 0x2ca   : > { %595 = vst.msk [vmem:[%s278_s21 + $0x18] sm:$0xff] %vm591_vm3, %v590_v3 }
 0x2cb   : > { %593 = vst.msk [vmem:[%s278_s21 + $0x8] sm:$0xff] %vm591_vm3, %v588_v4 }
 0x2cc PF: > { %s17_s24 = sadd.s32 1, %s756_s24  }
 0x2cd   : > { %p14_p4 = scmp.ge.s32.totalorder %s17_s24, 4  }
 0x2cf   :  { %16 = sbr.rel (!%p14_p4) target bundleno = 1 (0x1), region = 78 }

</bundles_post_ra>
